<compile_context>
chip_gen: v5e
topology: v5e:2x2
jax: 0.10.0
libtpu: 0.0.40
codegen_flags: <defaults>
</compile_context>

<pallas_src>
import functools

import jax
import jax.numpy as jnp
from jax.experimental import pallas as pl
from jax.experimental.pallas import tpu as pltpu

MARGIN = 0.1
LANES = 128
MAX_BLOCK_ROWS = 2048   # (2048,128) f32 tile = 1 MiB; 2 inputs x 2 bufs = 4 MiB VMEM
NUM_CORES = 2           # v7x megacore split; harmless on 1-TC chips


def _round_up(x, m):
    return ((x + m - 1) // m) * m


def _triplet_kernel(neg_ref, pos_ref, out_ref, acc_ref, *, margin):
    i = pl.program_id(1)

    @pl.when(i == 0)
    def _():
        acc_ref[...] = jnp.zeros_like(acc_ref)

    # Cast after the load: HBM traffic stays in the native (possibly narrow) dtype.
    neg = neg_ref[...].astype(jnp.float32)
    pos = pos_ref[...].astype(jnp.float32)

    # Elementwise hot path on the VPU; exact divide matches the PyTorch reference.
    loss = jnp.maximum(1.0 - pos / (neg + margin), 0.0)

    # Vector partial sums: fold (block_rows, 128) down to one (8, 128) vreg per
    # quantity with VPU adds only (no per-step cross-lane reduce, no SMEM RMW).
    n_sub = neg.shape[0] // 8
    acc_ref[0] += pos.reshape(n_sub, 8, LANES).sum(axis=0)
    acc_ref[1] += neg.reshape(n_sub, 8, LANES).sum(axis=0)
    acc_ref[2] += loss.reshape(n_sub, 8, LANES).sum(axis=0)

    @pl.when(i == pl.num_programs(1) - 1)
    def _():
        out_ref[0] = acc_ref[...]


def triplet_loss(neg_sim, pos_sim, margin=MARGIN):
    assert neg_sim.shape == pos_sim.shape
    total_n = int(neg_sim.size)

    neg_flat = neg_sim.reshape(-1)
    pos_flat = pos_sim.reshape(-1)

    rows = pl.cdiv(total_n, LANES)
    per_core_rows = pl.cdiv(rows, NUM_CORES)
    block_rows = min(MAX_BLOCK_ROWS, _round_up(per_core_rows, 8))
    steps = pl.cdiv(per_core_rows, block_rows)
    rows_padded = NUM_CORES * steps * block_rows
    n_pad = rows_padded * LANES - total_n

    if n_pad:
        # Pad neg with 1 and pos with 0: each padded element contributes
        # (pos, neg, loss) = (0, 1, 1); subtracted below.  (Assumes margin > -1.)
        neg_flat = jnp.concatenate(
            [neg_flat, jnp.full((n_pad,), 1.0, dtype=neg_flat.dtype)])
        pos_flat = jnp.concatenate(
            [pos_flat, jnp.zeros((n_pad,), dtype=pos_flat.dtype)])

    neg2d = neg_flat.reshape(rows_padded, LANES)
    pos2d = pos_flat.reshape(rows_padded, LANES)

    kernel = functools.partial(_triplet_kernel, margin=float(margin))
    in_map = lambda c, i, s=steps: (c * s + i, 0)

    partial = pl.pallas_call(
        kernel,
        out_shape=jax.ShapeDtypeStruct((NUM_CORES, 3, 8, LANES), jnp.float32),
        grid_spec=pltpu.PrefetchScalarGridSpec(
            num_scalar_prefetch=0,
            grid=(NUM_CORES, steps),
            in_specs=[
                pl.BlockSpec((block_rows, LANES), in_map),
                pl.BlockSpec((block_rows, LANES), in_map),
            ],
            out_specs=pl.BlockSpec((1, 3, 8, LANES),
                                   lambda c, i: (c, 0, 0, 0)),
            scratch_shapes=[pltpu.VMEM((3, 8, LANES), jnp.float32)],
        ),
        compiler_params=pltpu.CompilerParams(
            dimension_semantics=("parallel", "arbitrary"),
            vmem_limit_bytes=32 << 20),
    )(neg2d, pos2d)

    # Tiny final reduction (NUM_CORES x 3 x 8 x 128 floats) in plain JAX.
    sums = jnp.sum(partial, axis=(0, 2, 3))   # -> (pos_sum, neg_sum, loss_sum)
    pad = jnp.float32(n_pad)
    pos_sum = sums[0]
    neg_sum = sums[1] - pad
    loss_sum = sums[2] - pad
    inv_n = jnp.float32(1.0 / total_n)

    # Match the PyTorch return order: [mean(pos_sim), mean(neg_sim), mean(loss)]
    return [pos_sum * inv_n, neg_sum * inv_n, loss_sum * inv_n]


if __name__ == "__main__":
    key = jax.random.PRNGKey(0)
    k1, k2 = jax.random.split(key)
    # Similarity maps, NCHW: batch=2, channels=4, spatial=16x16.
    shape = (2, 4, 16, 16)
    neg_sim = jax.random.uniform(k1, shape, dtype=jnp.float32)
    pos_sim = jax.random.uniform(k2, shape, dtype=jnp.float32)

    pos_mean, neg_mean, loss_mean = triplet_loss(neg_sim, pos_sim)
    jax.block_until_ready((pos_mean, neg_mean, loss_mean))

    # Pure-JAX reference check.
    ref_loss = jnp.maximum(1.0 - pos_sim / (neg_sim + MARGIN), 0.0)
    ref = (jnp.mean(pos_sim), jnp.mean(neg_sim), jnp.mean(ref_loss))
    assert jnp.allclose(pos_mean, ref[0], atol=1e-5)
    assert jnp.allclose(neg_mean, ref[1], atol=1e-5)
    assert jnp.allclose(loss_mean, ref[2], atol=1e-5)

    print("KERNEL_OK")
</pallas_src>

<mosaic_0001>
module attributes {stable_mosaic.version = 11 : i64} {
  func.func @_triplet_kernel(%arg0: i32, %arg1: i32, %arg2: memref<8x128xf32, #tpu.memory_space<vmem>>, %arg3: memref<8x128xf32, #tpu.memory_space<vmem>>, %arg4: memref<1x3x8x128xf32, #tpu.memory_space<vmem>>, %arg5: memref<3x8x128xf32, #tpu.memory_space<vmem>>) attributes {dimension_semantics = [#tpu.dimension_semantics<parallel>, #tpu.dimension_semantics<arbitrary>], iteration_bounds = array<i64: 2, 1>, scalar_prefetch = 0 : i64, scratch_operands = 1 : i64, tpu.core_type = #tpu.core_type<tc>, window_params = [{transform_indices = @transform_0, window_bounds = array<i64: 8, 128>}, {transform_indices = @transform_1, window_bounds = array<i64: 8, 128>}, {transform_indices = @transform_2, window_bounds = array<i64: 1, 3, 8, 128>}]} {
    %c0_i32 = arith.constant 0 : i32
    %0 = arith.cmpi eq, %arg1, %c0_i32 : i32
    %1 = arith.extui %0 : i1 to i32
    %c0_i32_0 = arith.constant 0 : i32
    %2 = arith.cmpi ne, %1, %c0_i32_0 : i32
    scf.if %2 {
      %cst_27 = arith.constant 0.000000e+00 : f32
      %39 = vector.broadcast %cst_27 : f32 to vector<3x8x128xf32>
      %c0_28 = arith.constant 0 : index
      %c0_29 = arith.constant 0 : index
      %c0_30 = arith.constant 0 : index
      %40 = vector.load %arg5[%c0_28, %c0_29, %c0_30] : memref<3x8x128xf32, #tpu.memory_space<vmem>>, vector<3x8x128xf32>
      tpu.vector_store %arg5[%c0_28, %c0_29, %c0_30], %39 {strides = array<i32>} : memref<3x8x128xf32, #tpu.memory_space<vmem>>, vector<3x8x128xf32>,
    } else {
    }
    %c0 = arith.constant 0 : index
    %c0_1 = arith.constant 0 : index
    %3 = vector.load %arg2[%c0, %c0_1] : memref<8x128xf32, #tpu.memory_space<vmem>>, vector<8x128xf32>
    %c0_2 = arith.constant 0 : index
    %c0_3 = arith.constant 0 : index
    %4 = vector.load %arg3[%c0_2, %c0_3] : memref<8x128xf32, #tpu.memory_space<vmem>>, vector<8x128xf32>
    %cst = arith.constant 1.000000e-01 : f32
    %5 = vector.broadcast %cst : f32 to vector<8x128xf32>
    %6 = arith.addf %3, %5 : vector<8x128xf32>
    %7 = arith.divf %4, %6 : vector<8x128xf32>
    %cst_4 = arith.constant 1.000000e+00 : f32
    %8 = vector.broadcast %cst_4 : f32 to vector<8x128xf32>
    %9 = arith.subf %8, %7 : vector<8x128xf32>
    %cst_5 = arith.constant 0.000000e+00 : f32
    %10 = vector.broadcast %cst_5 : f32 to vector<8x128xf32>
    %11 = arith.maximumf %9, %10 : vector<8x128xf32>
    %c0_6 = arith.constant 0 : index
    %c0_7 = arith.constant 0 : index
    %c0_8 = arith.constant 0 : index
    %12 = vector.load %arg5[%c0_6, %c0_7, %c0_8] : memref<3x8x128xf32, #tpu.memory_space<vmem>>, vector<1x8x128xf32>
    %13 = vector.shape_cast %12 : vector<1x8x128xf32> to vector<8x128xf32>
    %14 = vector.shape_cast %4 : vector<8x128xf32> to vector<1x8x128xf32>
    %cst_9 = arith.constant dense<0.000000e+00> : vector<8x128xf32>
    %15 = vector.multi_reduction <add>, %14, %cst_9 [0] : vector<1x8x128xf32> to vector<8x128xf32>
    %16 = arith.addf %13, %15 : vector<8x128xf32>
    %c0_10 = arith.constant 0 : index
    %c0_11 = arith.constant 0 : index
    %c0_12 = arith.constant 0 : index
    %17 = vector.load %arg5[%c0_10, %c0_11, %c0_12] : memref<3x8x128xf32, #tpu.memory_space<vmem>>, vector<1x8x128xf32>
    %18 = vector.shape_cast %17 : vector<1x8x128xf32> to vector<8x128xf32>
    %19 = vector.shape_cast %16 : vector<8x128xf32> to vector<1x8x128xf32>
    tpu.vector_store %arg5[%c0_10, %c0_11, %c0_12], %19 {strides = array<i32>} : memref<3x8x128xf32, #tpu.memory_space<vmem>>, vector<1x8x128xf32>,
    %c1 = arith.constant 1 : index
    %c0_13 = arith.constant 0 : index
    %c0_14 = arith.constant 0 : index
    %20 = vector.load %arg5[%c1, %c0_13, %c0_14] : memref<3x8x128xf32, #tpu.memory_space<vmem>>, vector<1x8x128xf32>
    %21 = vector.shape_cast %20 : vector<1x8x128xf32> to vector<8x128xf32>
    %22 = vector.shape_cast %3 : vector<8x128xf32> to vector<1x8x128xf32>
    %cst_15 = arith.constant dense<0.000000e+00> : vector<8x128xf32>
    %23 = vector.multi_reduction <add>, %22, %cst_15 [0] : vector<1x8x128xf32> to vector<8x128xf32>
    %24 = arith.addf %21, %23 : vector<8x128xf32>
    %c1_16 = arith.constant 1 : index
    %c0_17 = arith.constant 0 : index
    %c0_18 = arith.constant 0 : index
    %25 = vector.load %arg5[%c1_16, %c0_17, %c0_18] : memref<3x8x128xf32, #tpu.memory_space<vmem>>, vector<1x8x128xf32>
    %26 = vector.shape_cast %25 : vector<1x8x128xf32> to vector<8x128xf32>
    %27 = vector.shape_cast %24 : vector<8x128xf32> to vector<1x8x128xf32>
    tpu.vector_store %arg5[%c1_16, %c0_17, %c0_18], %27 {strides = array<i32>} : memref<3x8x128xf32, #tpu.memory_space<vmem>>, vector<1x8x128xf32>,
    %c2 = arith.constant 2 : index
    %c0_19 = arith.constant 0 : index
    %c0_20 = arith.constant 0 : index
    %28 = vector.load %arg5[%c2, %c0_19, %c0_20] : memref<3x8x128xf32, #tpu.memory_space<vmem>>, vector<1x8x128xf32>
    %29 = vector.shape_cast %28 : vector<1x8x128xf32> to vector<8x128xf32>
    %30 = vector.shape_cast %11 : vector<8x128xf32> to vector<1x8x128xf32>
    %cst_21 = arith.constant dense<0.000000e+00> : vector<8x128xf32>
    %31 = vector.multi_reduction <add>, %30, %cst_21 [0] : vector<1x8x128xf32> to vector<8x128xf32>
    %32 = arith.addf %29, %31 : vector<8x128xf32>
    %c2_22 = arith.constant 2 : index
    %c0_23 = arith.constant 0 : index
    %c0_24 = arith.constant 0 : index
    %33 = vector.load %arg5[%c2_22, %c0_23, %c0_24] : memref<3x8x128xf32, #tpu.memory_space<vmem>>, vector<1x8x128xf32>
    %34 = vector.shape_cast %33 : vector<1x8x128xf32> to vector<8x128xf32>
    %35 = vector.shape_cast %32 : vector<8x128xf32> to vector<1x8x128xf32>
    tpu.vector_store %arg5[%c2_22, %c0_23, %c0_24], %35 {strides = array<i32>} : memref<3x8x128xf32, #tpu.memory_space<vmem>>, vector<1x8x128xf32>,
    %c0_i32_25 = arith.constant 0 : i32
    %36 = arith.cmpi eq, %arg1, %c0_i32_25 : i32
    %37 = arith.extui %36 : i1 to i32
    %c0_i32_26 = arith.constant 0 : i32
    %38 = arith.cmpi ne, %37, %c0_i32_26 : i32
    scf.if %38 {
      %c0_27 = arith.constant 0 : index
      %c0_28 = arith.constant 0 : index
      %c0_29 = arith.constant 0 : index
      %39 = vector.load %arg5[%c0_27, %c0_28, %c0_29] : memref<3x8x128xf32, #tpu.memory_space<vmem>>, vector<3x8x128xf32>
      %c0_30 = arith.constant 0 : index
      %c0_31 = arith.constant 0 : index
      %c0_32 = arith.constant 0 : index
      %c0_33 = arith.constant 0 : index
      %40 = vector.load %arg4[%c0_30, %c0_31, %c0_32, %c0_33] : memref<1x3x8x128xf32, #tpu.memory_space<vmem>>, vector<1x3x8x128xf32>
      %41 = vector.shape_cast %40 : vector<1x3x8x128xf32> to vector<3x8x128xf32>
      %42 = vector.shape_cast %39 : vector<3x8x128xf32> to vector<1x3x8x128xf32>
      tpu.vector_store %arg4[%c0_30, %c0_31, %c0_32, %c0_33], %42 {strides = array<i32>} : memref<1x3x8x128xf32, #tpu.memory_space<vmem>>, vector<1x3x8x128xf32>,
    } else {
    }
    return
  }
  func.func @transform_0(%arg0: i32, %arg1: i32) -> (i32, i32) {
    %c1_i32 = arith.constant 1 : i32
    %0 = arith.muli %arg0, %c1_i32 : i32
    %1 = arith.addi %0, %arg1 : i32
    %c0_i32 = arith.constant 0 : i32
    %c0_i32_0 = arith.constant 0 : i32
    return %1, %c0_i32 : i32, i32
  }
  func.func @transform_1(%arg0: i32, %arg1: i32) -> (i32, i32) {
    %c1_i32 = arith.constant 1 : i32
    %0 = arith.muli %arg0, %c1_i32 : i32
    %1 = arith.addi %0, %arg1 : i32
    %c0_i32 = arith.constant 0 : i32
    %c0_i32_0 = arith.constant 0 : i32
    return %1, %c0_i32 : i32, i32
  }
  func.func @transform_2(%arg0: i32, %arg1: i32) -> (i32, i32, i32, i32) {
    %c0_i32 = arith.constant 0 : i32
    %c0_i32_0 = arith.constant 0 : i32
    %c0_i32_1 = arith.constant 0 : i32
    %c0_i32_2 = arith.constant 0 : i32
    return %arg0, %c0_i32, %c0_i32_0, %c0_i32_1 : i32, i32, i32, i32
  }
}

</mosaic_0001>

<bundles_post_ra>
// kernel: tpu_custom_call.1
= control target key start
LH: loop header
LB: loop body
LE: loop exit
PB: predicated region body
PF: predicated region fallthrough
CT: control target
= control target key end

     0   :  { %7 = vsyncpa [#allocation4], 0  ;;  %s773_s0 = inlined_call_operand.hbm [shape: f32[16,128], index: 0, kind: input, shape index: {}]   ;;  %s774_s1 = inlined_call_operand.hbm [shape: f32[16,128], index: 1, kind: input, shape index: {}]   ;;  %s775_s2 = inlined_call_operand.hbm [shape: f32[2,3,8,128], index: 2, kind: output, shape index: {}]  }
   0x1   :  { %9 = vsyncpa [#allocation4 + $0x1], 0 }
   0x2   :  { %10 = vsyncpa [#allocation7], 0 }
   0x3   :  { %12 = vsyncpa [#allocation7 + $0x1], 0 }
   0x4   :  { %13 = vsyncpa [#allocation5], 0 }
   0x5   :  { %15 = vsyncpa [#allocation5 + $0x1], 0  ;;  %s644_s9 = smov 0   ;;  %s646_s10 = smov 0  }
   0x6   :  { %s648_s11 = smov 0   ;;  %s650_s12 = smov 0  }
   0x7   :  { %s652_s13 = smov 0   ;;  %s654_s14 = smov 0  }
   0x8 LB: > { %s392_s15 = sadd.s32 4294967295, %s625_s14   ;;  %s393_s16 = sadd.s32 4294967294, %s625_s14   ;;  %s625_s14 = sphi %s654_s14, %s21_s14   ;;  %s621_s13 = sphi %s652_s13, %s784_s13   ;;  %s617_s12 = sphi %s650_s12, %s783_s12   ;;  %s613_s11 = sphi %s648_s11, %s782_s11   ;;  %s609_s10 = sphi %s646_s10, %s781_s10   ;;  %s605_s9 = sphi %s644_s9, %s780_s9  }
   0x9   : > { %s33_s17 = sadd.s32 1, %s621_s13  ;;  %s42_s18 = sadd.s32 1, %s613_s11 }
   0xa   : > { %p35_p0 = scmp.ge.s32.totalorder %s33_s17, 2  ;;  %p49_p1 = scmp.ne.s32.totalorder %s613_s11, %s609_s10 }
   0xb   : > { %p50_p2 = scmp.eq.s32.totalorder %s625_s14, 0  ;;  %p55_p3 = scmp.ne.s32.totalorder %s609_s10, %s605_s9 }
   0xc   : > { %s786_s17 = smov (%p35_p0, %s33_s17), 0  ;;  %p56_p5 = scmp.eq.s32.totalorder %s392_s15, 0 }
   0xd   : > { %p685_p4 = por %p50_p2, %p49_p1  ;;  %s39_s20 = ssub.s32 %s621_s13, %s786_s17 }
   0xe   : > { %p107_p6 = scmp.eq.s32.totalorder %s392_s15, 1  ;;  %p40_p7 = scmp.eq.s32.totalorder %s39_s20, 0 }
   0xf   : > { %p691_p8 = por %p56_p5, %p55_p3  ;;  %p113_p10 = scmp.eq.s32.totalorder %s393_s16, 1 }
  0x10   : > { %p695_p9 = por %p107_p6, %p49_p1  ;;  %p395_p12 = scmp.ge.s32.totalorder %s625_s14, 2 }
  0x11   : > { %s700_s23 = scalar_select %p40_p7, %s613_s11, %s42_s18  }
  0x12   : > { %p702_p11 = por %p113_p10, %p55_p3  ;;  %p425_p13 = scmp.lt.s32.totalorder %s625_s14, 2 }
  0x13   : > { %s133_s25 = sand.u32 1, %s613_s11   ;;  %s397_s27 = sshll.u32 %s621_s13, 3 }
  0x14   : > { %s396_s26 = sshll.u32 %s133_s25, 3  ;;  %s142_s30 = scalar_lea.hbm %s773_s0, %s397_s27 }
  0x15   : > { %s137_s3 = scalar_lea.vmem [#allocation3], %s396_s26  ;;  %s144_s5 = sshll.u32 %s142_s30, 4  ;;  %s145_s5 = int_to_ptr.hbm [resolvable:$true] %s144_s5 }
  0x16   : > { %s146_s4 = sshll.u32 %s137_s3, 4  ;;  %p415_p0 = pnand %p425_p13, %p685_p4  ;;  %s147_s4 = int_to_ptr.vmem [resolvable:$true] %s146_s4 }
  0x17   : > { %p400_p1 = scmp.ge.s32.totalorder %s625_s14, 1  ;;  %p171_p2 = scmp.lt.s32.totalorder %s625_s14, 3 }
  0x18   : > { %s134_s6 = scalar_lea.sflag [#allocation4], %s133_s25  ;;  %s162_s15 = scalar_lea.hbm %s774_s1, %s397_s27 }
  0x19   : > { %417 = dma.hbm_to_vmem [thread:$0]  (!%p415_p0), %s145_s5, 128, %s147_s4, %s134_s6  }
  0x1a   : > { %p172_p3 = pnand %p400_p1, %p171_p2  ;;  %s157_s16 = scalar_lea.vmem [#allocation6], %s396_s26 }
  0x1b   : > { %s166_s18 = sshll.u32 %s157_s16, 4  ;;  %s164_s20 = sshll.u32 %s162_s15, 4  ;;  %s167_s18 = int_to_ptr.vmem [resolvable:$true] %s166_s18  ;;  %s165_s20 = int_to_ptr.hbm [resolvable:$true] %s164_s20 }
  0x1c   : > { %s154_s28 = scalar_lea.sflag [#allocation7], %s133_s25  ;;  %175 = sbr.rel (%p172_p3) target bundleno = 66 (0x42), region = 28 }
  0x1d   : > { %420 = dma.hbm_to_vmem [thread:$0]  (!%p415_p0), %s165_s20, 128, %s167_s18, %s154_s28  }
  0x1e   : > { %s721_s19 = sand.u32 (!%p172_p3), 1, %s609_s10  }
  0x1f   : > { %s401_s29 = sshll.u32 (!%p172_p3), %s721_s19, 3  ;;  %s178_s30 = scalar_lea.sflag (!%p172_p3), [#allocation4], %s721_s19 }
  0x20   : > { %s181_s3 = scalar_lea.vmem (!%p172_p3), [#allocation3], %s401_s29 }
  0x21   : > { %592 = dma.done.wait (%p691_p8), %s178_s30, 128  }
  0x22   : > { %594 = vsyncadd (%p691_p8), %s178_s30, 4294967168  ;;  %s188_s26 = scalar_lea.sflag [#allocation7], %s721_s19  ;;  %s191_s25 = scalar_lea.vmem [#allocation6], %s401_s29 }
  0x23   : > { %596 = dma.done.wait (%p691_p8), %s188_s26, 128  }
  0x24   : > { %598 = vsyncadd (%p691_p8), %s188_s26, 4294967168  ;;  %s406_s27 = smul.u32 24, %s721_s19  ;;  %v228_v0 = vld [vmem:[%s191_s25] sm:$0xff]  ;;  %v227_v1 = vld [vmem:[%s181_s3] sm:$0xff]  ;;  %s559_s29 = scalar_lea.hbm %s775_s2, 48 }
  0x25   : > { %v229_v2 = vadd.f32 0.1, %v227_v1  ;;  %s407_s21 = smul.u32 24, %s617_s12  ;;  %s271_s12 = scalar_lea.sflag [#allocation5], %s721_s19 }
  0x26   : > { %s217_s4 = scalar_lea.vmem [#allocation8], %s406_s27 }
  0x27   : > { %267 = vst [vmem:[%s217_s4] sm:$0xff] %v228_v0  ;;  %477 = vrcp.f32 %v229_v2  ;;  %v241_v5 = vand.u32 2147483648, %v229_v2  ;;  %vm235_vm0 = vweird.f32 %v229_v2  ;;  %v239_v7 = vand.u32 2147483647, %v229_v2  ;;  %s282_s7 = scalar_lea.hbm %s775_s2, %s407_s21  ;;  %s283_s8 = sshll.u32 %s217_s4, 4  ;;  %s284_s8 = int_to_ptr.vmem [resolvable:$true] %s283_s8 }
  0x28   : > { %268 = vst [vmem:[%s217_s4 + $0x8] sm:$0xff] %v227_v1  ;;  %s285_s15 = sshll.u32 %s282_s7, 4  ;;  %s286_s15 = int_to_ptr.hbm [resolvable:$true] %s285_s15 }
  0x29   : > { %v242_v9 = vor.u32 1.1754944e-38, %v241_v5  ;;  %vm240_vm3 = vcmp.eq.f32.partialorder %v239_v7, 8.507059e+37  ;;  %s553_s16 = sshra.s32 %s286_s15, 4  ;;  %s554_s16 = int_to_ptr.hbm [resolvable:$true] %s553_s16 }
  0x2a   : > { %s555_s18 = scalar_lea.hbm %s554_s16, 24  ;;  %p560_p7 = scmp.lt.s32.totalorder %s554_s16, %s775_s2 }
  0x2b   : > { %p556_p4 = scmp.ne.s32.totalorder %s554_s16, %s555_s18  ;;  %p561_p8 = scmp.lt.s32.totalorder %s559_s29, %s555_s18 }
  0x2d   : > { %v478_v3 = vpop.eup %477  ;;  %p557_p5 = pnand %p556_p4, %p695_p9  ;;  %p562_p10 = por %p561_p8, %p560_p7 }
  0x2e   : > { %v231_v4 = vmul.f32 %v478_v3, %v229_v2  ;;  %vm236_vm1 = vweird.f32 %v478_v3 }
  0x2f   : > { %vm237_vm2 = vmor %vm235_vm0, %vm236_vm1  ;;  %p558_p6 = pneg %p557_p5 }
  0x30   : > { %v232_v6 = vsub.f32 1.0, %v231_v4 }
  0x31   : > { %p563_p13 = pnand %p562_p10, %p558_p6 }
  0x32   : > { %v233_v8 = vmul.f32 %v478_v3, %v232_v6 }
  0x34   : > { %v234_v10 = vadd.f32 %v478_v3, %v233_v8 }
  0x36   : > { %v238_v11 = vsel %vm237_vm2, %v478_v3, %v234_v10 }
  0x37   : > { %v243_v12 = vsel %vm240_vm3, %v242_v9, %v238_v11 }
  0x38   : > { %v244_v13 = vmul.f32 %v243_v12, %v228_v0 }
  0x3a   : > { %v245_v14 = vsub.f32 1.0, %v244_v13 }
  0x3c   : > { %v246_v15 = vmax.f32 %v245_v14, 0.0 }
  0x3e   : > { %269 = vst [vmem:[%s217_s4 + $0x10] sm:$0xff] %v246_v15 }
  0x3f   : > { %566 = shalt.err (!%p563_p13)
}
  0x40   : > { %s627_s19 = smov 128   ;;  %s628_s26 = smov 8  }
  0x41   : > { %412 = dma.vmem_to_hbm [thread:$0]  (%p695_p9), %s284_s8, 384, %s286_s15, %s271_s12, %s627_s19, %s627_s19, %s628_s26  }
  0x42 PF: > { %s300_s25 = sand.u32 1, %s605_s9   ;;  %p422_p0 = pnand %p395_p12, %p702_p11 }
  0x43   : > { %s301_s27 = scalar_lea.sflag [#allocation5], %s300_s25 }
  0x44   : > { %p423_p1 = pneg %p422_p0 }
  0x46   : > { %600 = dma.done.wait (%p423_p1), %s301_s27, 384  }
  0x47   : > { %602 = vsyncadd (%p423_p1), %s301_s27, 4294966912  ;;  %s21_s14 = sadd.s32 1, %s625_s14   ;;  %s780_s9 = smov %s609_s10 }
  0x48   : > { %p18_p2 = scmp.ge.s32.totalorder %s21_s14, 4   ;;  %s781_s10 = smov %s613_s11 }
  0x49   : > { %s782_s11 = smov %s700_s23  ;;  %s783_s12 = smov %s621_s13 }
  0x4a   : > { %s784_s13 = smov %s786_s17  ;;  %20 = sbr.rel (!%p18_p2) target bundleno = 8 (0x8), region = 96 }
  0x4f   :  { %307 = vsyncpa [#allocation4], 1 }
  0x50   :  { %309 = vsyncpa [#allocation4 + $0x1], 1 }
  0x51   :  { %310 = vsyncpa [#allocation7], 1 }
  0x52   :  { %312 = vsyncpa [#allocation7 + $0x1], 1 }
  0x53   :  { %313 = vsyncpa [#allocation5], 1 }
  0x54   :  { %315 = vsyncpa [#allocation5 + $0x1], 1 }

</bundles_post_ra>
